<compile_context>
chip_gen: v7x
topology: tpu7x:2x2x1
jax: 0.10.0
libtpu: 0.0.40
codegen_flags: <defaults>
</compile_context>

<pallas_src>
import jax
import jax.numpy as jnp
from jax.experimental import pallas as pl
from jax.experimental.pallas import tpu as pltpu

WIDTH_MULT_LIST = [0.25, 0.5, 0.75, 1.0]


def _pick_tile(n, unit, max_tile):
    """Largest multiple of `unit` that divides n and is <= max_tile, else n (full dim)."""
    best = None
    t = unit
    while t <= min(n, max_tile):
        if n % t == 0:
            best = t
        t += unit
    return best if best is not None else n


# ----------------------------------------------------------------------------
# Kernel 1: per-channel sum / sum-of-squares reduction (training-mode stats)
# ----------------------------------------------------------------------------
def _bn_stats_kernel(x_ref, sum_ref, ssq_ref):
    # x_ref: (TC, THW) ; sum_ref/ssq_ref: (TC, 1) resident accumulators.
    @pl.when((pl.program_id(1) == 0) & (pl.program_id(2) == 0))
    def _():
        sum_ref[...] = jnp.zeros_like(sum_ref)
        ssq_ref[...] = jnp.zeros_like(ssq_ref)

    x = x_ref[...].astype(jnp.float32)
    sum_ref[...] += jnp.sum(x, axis=-1, keepdims=True)
    ssq_ref[...] += jnp.sum(x * x, axis=-1, keepdims=True)


def _bn_batch_stats(x3, tc, thw):
    """x3: (B, C, HW). Returns per-channel (sum, sum_sq), each (C, 1) f32."""
    B, C, HW = x3.shape
    grid = (C // tc, B, HW // thw)
    return pl.pallas_call(
        _bn_stats_kernel,
        out_shape=(jax.ShapeDtypeStruct((C, 1), jnp.float32),
                   jax.ShapeDtypeStruct((C, 1), jnp.float32)),
        grid=grid,
        in_specs=[pl.BlockSpec((None, tc, thw), lambda c, b, s: (b, c, s))],
        out_specs=(pl.BlockSpec((tc, 1), lambda c, b, s: (c, 0)),
                   pl.BlockSpec((tc, 1), lambda c, b, s: (c, 0))),
        compiler_params=pltpu.CompilerParams(
            dimension_semantics=("parallel", "arbitrary", "arbitrary")),
    )(x3)


# ----------------------------------------------------------------------------
# Kernel 2: elementwise affine normalization  y = x * scale + shift
# ----------------------------------------------------------------------------
def _bn_norm_kernel(x_ref, scale_ref, shift_ref, o_ref):
    x = x_ref[...].astype(jnp.float32)                  # (TC, THW)
    y = x * scale_ref[...] + shift_ref[...]             # (TC, 1) broadcast on lanes
    o_ref[...] = y.astype(o_ref.dtype)


def _bn_apply(x3, scale, shift, tc, thw):
    B, C, HW = x3.shape
    grid = (C // tc, B, HW // thw)
    return pl.pallas_call(
        _bn_norm_kernel,
        out_shape=jax.ShapeDtypeStruct((B, C, HW), x3.dtype),
        grid=grid,
        in_specs=[pl.BlockSpec((None, tc, thw), lambda c, b, s: (b, c, s)),
                  pl.BlockSpec((tc, 1), lambda c, b, s: (c, 0)),
                  pl.BlockSpec((tc, 1), lambda c, b, s: (c, 0))],
        out_specs=pl.BlockSpec((None, tc, thw), lambda c, b, s: (b, c, s)),
        compiler_params=pltpu.CompilerParams(
            dimension_semantics=("parallel", "parallel", "parallel")),
    )(x3, scale, shift)


# ----------------------------------------------------------------------------
# Wrapper: SwitchableBatchNorm2d forward
# ----------------------------------------------------------------------------
def switchable_batchnorm2d_forward(x_nchw, bn_params,
                                   width_mult=max(WIDTH_MULT_LIST),
                                   training=True, eps=1e-5):
    """x_nchw: (B, C, H, W). bn_params: list of per-width BN param dicts."""
    idx = WIDTH_MULT_LIST.index(width_mult)
    p = bn_params[idx]
    gamma = p["weight"].astype(jnp.float32)
    beta = p["bias"].astype(jnp.float32)

    B, C, H, W = x_nchw.shape
    assert C == gamma.shape[0], "input channels must match selected BN width"
    HW = H * W
    x3 = x_nchw.reshape(B, C, HW)                 # free reshape, no transpose

    tc = _pick_tile(C, 8, 128)                    # channel (sublane) tile
    thw = _pick_tile(HW, 128, 2048)               # spatial (lane) tile

    if training:
        sums, ssqs = _bn_batch_stats(x3, tc, thw)
        count = jnp.float32(B * HW)
        mean = sums[:, 0] / count
        var = ssqs[:, 0] / count - mean * mean    # biased var (PyTorch uses it to normalize)
    else:
        mean = p["running_mean"].astype(jnp.float32)
        var = p["running_var"].astype(jnp.float32)

    inv = gamma * jax.lax.rsqrt(var + jnp.float32(eps))
    scale = inv.reshape(C, 1)
    shift = (beta - mean * inv).reshape(C, 1)

    # TODO(synk): PyTorch training mode additionally updates running_mean /
    # running_var in-place (momentum, unbiased var); that is module state, not
    # part of the returned tensor, so it is not emitted here.

    y3 = _bn_apply(x3, scale, shift, tc, thw)
    return y3.reshape(B, C, H, W)


# ----------------------------------------------------------------------------
# Pure-JAX reference for validation
# ----------------------------------------------------------------------------
def _ref_forward(x, bn_params, width_mult=max(WIDTH_MULT_LIST),
                 training=True, eps=1e-5):
    idx = WIDTH_MULT_LIST.index(width_mult)
    p = bn_params[idx]
    if training:
        mean = jnp.mean(x, axis=(0, 2, 3))
        var = jnp.var(x, axis=(0, 2, 3))
    else:
        mean = p["running_mean"]
        var = p["running_var"]
    xh = (x - mean[None, :, None, None]) * jax.lax.rsqrt(
        var[None, :, None, None] + eps)
    return xh * p["weight"][None, :, None, None] + p["bias"][None, :, None, None]


# ----------------------------------------------------------------------------
# Deterministic synthetic parameters (one BN per width)
# ----------------------------------------------------------------------------
def init_params(key, num_features_list):
    params = []
    for i, nf in enumerate(num_features_list):
        k1, k2, k3, k4 = jax.random.split(jax.random.fold_in(key, i), 4)
        params.append({
            "weight": 1.0 + 0.1 * jax.random.normal(k1, (nf,), jnp.float32),
            "bias": 0.1 * jax.random.normal(k2, (nf,), jnp.float32),
            "running_mean": 0.1 * jax.random.normal(k3, (nf,), jnp.float32),
            "running_var": 1.0 + 0.1 * jnp.abs(jax.random.normal(k4, (nf,), jnp.float32)),
        })
    return params


if __name__ == "__main__":
    key = jax.random.PRNGKey(0)
    k_x, k_p, k_x2 = jax.random.split(key, 3)

    base = 32
    num_features_list = [int(base * m) for m in WIDTH_MULT_LIST]   # [8, 16, 24, 32]
    params = init_params(k_p, num_features_list)

    # Module default: width_mult = max(WIDTH_MULT_LIST) -> widest BN (C = 32).
    B, H, W = 2, 16, 16
    C = num_features_list[WIDTH_MULT_LIST.index(1.0)]
    x = jax.random.normal(k_x, (B, C, H, W), jnp.float32)

    # training-mode (batch statistics) — the default state of a fresh nn.Module
    y = jax.block_until_ready(
        switchable_batchnorm2d_forward(x, params, width_mult=1.0, training=True))
    y_ref = _ref_forward(x, params, width_mult=1.0, training=True)
    assert y.shape == (B, C, H, W)
    assert jnp.allclose(y, y_ref, atol=1e-4, rtol=1e-4), "train-mode mismatch"

    # eval-mode (running statistics) on the same width
    y_e = jax.block_until_ready(
        switchable_batchnorm2d_forward(x, params, width_mult=1.0, training=False))
    y_e_ref = _ref_forward(x, params, width_mult=1.0, training=False)
    assert jnp.allclose(y_e, y_e_ref, atol=1e-4, rtol=1e-4), "eval-mode mismatch"

    # exercise the "switch": narrower width selects a different BN (C = 16)
    C2 = num_features_list[WIDTH_MULT_LIST.index(0.5)]
    x2 = jax.random.normal(k_x2, (B, C2, H, W), jnp.float32)
    y2 = jax.block_until_ready(
        switchable_batchnorm2d_forward(x2, params, width_mult=0.5, training=True))
    y2_ref = _ref_forward(x2, params, width_mult=0.5, training=True)
    assert jnp.allclose(y2, y2_ref, atol=1e-4, rtol=1e-4), "switched-width mismatch"

    print("KERNEL_OK")
</pallas_src>

<mosaic_0001>
module attributes {stable_mosaic.version = 11 : i64} {
  func.func @_bn_stats_kernel(%arg0: i32, %arg1: i32, %arg2: i32, %arg3: memref<1x32x256xf32, #tpu.memory_space<vmem>>, %arg4: memref<32x1xf32, #tpu.memory_space<vmem>>, %arg5: memref<32x1xf32, #tpu.memory_space<vmem>>) attributes {dimension_semantics = [#tpu.dimension_semantics<parallel>, #tpu.dimension_semantics<arbitrary>, #tpu.dimension_semantics<arbitrary>], iteration_bounds = array<i64: 1, 2, 1>, scalar_prefetch = 0 : i64, scratch_operands = 0 : i64, tpu.core_type = #tpu.core_type<tc>, window_params = [{transform_indices = @transform_0, window_bounds = array<i64: 1, 32, 256>}, {transform_indices = @transform_1, window_bounds = array<i64: 32, 1>}, {transform_indices = @transform_2, window_bounds = array<i64: 32, 1>}]} {
    %c0_i32 = arith.constant 0 : i32
    %0 = arith.cmpi eq, %arg1, %c0_i32 : i32
    %c0_i32_0 = arith.constant 0 : i32
    %1 = arith.cmpi eq, %arg2, %c0_i32_0 : i32
    %2 = arith.andi %0, %1 : i1
    %3 = arith.extui %2 : i1 to i32
    %c0_i32_1 = arith.constant 0 : i32
    %4 = arith.cmpi ne, %3, %c0_i32_1 : i32
    scf.if %4 {
      %cst_13 = arith.constant 0.000000e+00 : f32
      %18 = vector.broadcast %cst_13 : f32 to vector<32x1xf32>
      %c0_14 = arith.constant 0 : index
      %c0_15 = arith.constant 0 : index
      %19 = vector.load %arg4[%c0_14, %c0_15] : memref<32x1xf32, #tpu.memory_space<vmem>>, vector<32x1xf32>
      tpu.vector_store %arg4[%c0_14, %c0_15], %18 {strides = array<i32>} : memref<32x1xf32, #tpu.memory_space<vmem>>, vector<32x1xf32>,
      %cst_16 = arith.constant 0.000000e+00 : f32
      %20 = vector.broadcast %cst_16 : f32 to vector<32x1xf32>
      %c0_17 = arith.constant 0 : index
      %c0_18 = arith.constant 0 : index
      %21 = vector.load %arg5[%c0_17, %c0_18] : memref<32x1xf32, #tpu.memory_space<vmem>>, vector<32x1xf32>
      tpu.vector_store %arg5[%c0_17, %c0_18], %20 {strides = array<i32>} : memref<32x1xf32, #tpu.memory_space<vmem>>, vector<32x1xf32>,
    } else {
    }
    %c0 = arith.constant 0 : index
    %c0_2 = arith.constant 0 : index
    %c0_3 = arith.constant 0 : index
    %5 = vector.load %arg3[%c0, %c0_2, %c0_3] : memref<1x32x256xf32, #tpu.memory_space<vmem>>, vector<1x32x256xf32>
    %6 = vector.shape_cast %5 : vector<1x32x256xf32> to vector<32x256xf32>
    %c0_4 = arith.constant 0 : index
    %c0_5 = arith.constant 0 : index
    %7 = vector.load %arg4[%c0_4, %c0_5] : memref<32x1xf32, #tpu.memory_space<vmem>>, vector<32x1xf32>
    %cst = arith.constant dense<0.000000e+00> : vector<32xf32>
    %8 = vector.multi_reduction <add>, %6, %cst [1] : vector<32x256xf32> to vector<32xf32>
    %9 = vector.shape_cast %8 : vector<32xf32> to vector<32x1xf32>
    %10 = arith.addf %7, %9 : vector<32x1xf32>
    %c0_6 = arith.constant 0 : index
    %c0_7 = arith.constant 0 : index
    %11 = vector.load %arg4[%c0_6, %c0_7] : memref<32x1xf32, #tpu.memory_space<vmem>>, vector<32x1xf32>
    tpu.vector_store %arg4[%c0_6, %c0_7], %10 {strides = array<i32>} : memref<32x1xf32, #tpu.memory_space<vmem>>, vector<32x1xf32>,
    %c0_8 = arith.constant 0 : index
    %c0_9 = arith.constant 0 : index
    %12 = vector.load %arg5[%c0_8, %c0_9] : memref<32x1xf32, #tpu.memory_space<vmem>>, vector<32x1xf32>
    %13 = arith.mulf %6, %6 : vector<32x256xf32>
    %cst_10 = arith.constant dense<0.000000e+00> : vector<32xf32>
    %14 = vector.multi_reduction <add>, %13, %cst_10 [1] : vector<32x256xf32> to vector<32xf32>
    %15 = vector.shape_cast %14 : vector<32xf32> to vector<32x1xf32>
    %16 = arith.addf %12, %15 : vector<32x1xf32>
    %c0_11 = arith.constant 0 : index
    %c0_12 = arith.constant 0 : index
    %17 = vector.load %arg5[%c0_11, %c0_12] : memref<32x1xf32, #tpu.memory_space<vmem>>, vector<32x1xf32>
    tpu.vector_store %arg5[%c0_11, %c0_12], %16 {strides = array<i32>} : memref<32x1xf32, #tpu.memory_space<vmem>>, vector<32x1xf32>,
    return
  }
  func.func @transform_0(%arg0: i32, %arg1: i32, %arg2: i32) -> (i32, i32, i32) {
    %c0_i32 = arith.constant 0 : i32
    return %arg1, %arg0, %arg2 : i32, i32, i32
  }
  func.func @transform_1(%arg0: i32, %arg1: i32, %arg2: i32) -> (i32, i32) {
    %c0_i32 = arith.constant 0 : i32
    %c0_i32_0 = arith.constant 0 : i32
    return %arg0, %c0_i32 : i32, i32
  }
  func.func @transform_2(%arg0: i32, %arg1: i32, %arg2: i32) -> (i32, i32) {
    %c0_i32 = arith.constant 0 : i32
    %c0_i32_0 = arith.constant 0 : i32
    return %arg0, %c0_i32 : i32, i32
  }
}

</mosaic_0001>

<bundles_post_ra>
// kernel: tpu_custom_call.1
= control target key start
LH: loop header
LB: loop body
LE: loop exit
PB: predicated region body
PF: predicated region fallthrough
CT: control target
= control target key end

     0   :  { %8 = vsyncpa [#allocation3], 0  ;;  %s777_s0 = inlined_call_operand.hbm [shape: f32[2,32,256], index: 0, kind: input, shape index: {}]   ;;  %s778_s1 = inlined_call_operand.vmem [shape: f32[32,1], index: 1, kind: output, shape index: {0}]   ;;  %s779_s2 = inlined_call_operand.vmem [shape: f32[32,1], index: 2, kind: output, shape index: {1}]  }
   0x1   :  { %10 = vsyncpa [#allocation3 + $0x1], 0  ;;  %s577_s9 = smov 0   ;;  %s579_s10 = smov 0  }
   0x2   :  { %s581_s11 = smov 0   ;;  %s583_s12 = smov 0  }
   0x3   :  { %s585_s13 = smov 0   ;;  %s587_s14 = smov 0  }
   0x4 LB: > { %s401_s15 = sadd.s32 4294967295, %s556_s14   ;;  %s31_s16 = sadd.s32 1, %s552_s13  ;;  %s556_s14 = sphi %s587_s14, %s16_s14   ;;  %s552_s13 = sphi %s585_s13, %s787_s13   ;;  %s548_s12 = sphi %s583_s12, %s786_s12   ;;  %s544_s11 = sphi %s581_s11, %s785_s11   ;;  %s540_s10 = sphi %s579_s10, %s784_s10   ;;  %s536_s9 = sphi %s577_s9, %s783_s9  }
   0x5   : > { %p33_p0 = scmp.ge.s32.totalorder %s31_s16, 2  ;;  %s46_s17 = sadd.s32 1, %s544_s11 }
   0x6   : > { %p53_p1 = scmp.ne.s32.totalorder %s544_s11, %s540_s10  ;;  %p54_p2 = scmp.eq.s32.totalorder %s556_s14, 0 }
   0x7   : > { %s789_s16 = smov (%p33_p0, %s31_s16), 0  ;;  %p59_p4 = scmp.ne.s32.totalorder %s540_s10, %s536_s9 }
   0x8   : > { %p613_p3 = por %p54_p2, %p53_p1  ;;  %s39_s19 = ssub.s32 %s552_s13, %s789_s16 }
   0x9   : > { %p60_p5 = scmp.eq.s32.totalorder %s401_s15, 0  ;;  %p44_p6 = scmp.eq.s32.totalorder %s39_s19, 0 }
   0xa   : > { %p424_p8 = scmp.lt.s32.totalorder %s556_s14, 2  ;;  %s135_s22 = sand.u32 1, %s544_s11  }
   0xb   : > { %p620_p7 = por %p60_p5, %p59_p4  ;;  %s416_s23 = sshll.u32 %s552_s13, 10 }
   0xc   : > { %s626_s21 = scalar_select %p44_p6, %s544_s11, %s46_s17  }
   0xd   : > { %s404_s24 = sshll.u32 %s135_s22, 6  ;;  %s633_s27 = scalar_lea.hbm %s777_s0, %s416_s23 }
   0xe   : > { %s139_s28 = scalar_lea.vmem [#allocation2], %s404_s24  ;;  %p637_p9 = pnand %p424_p8, %p613_p3 }
   0xf   : > { %s151_s29 = sshll.u32 %s139_s28, 4  ;;  %s643_s3 = scalar_lea.sflag [#allocation3], %s135_s22  ;;  %s641_s29 = int_to_ptr.vmem [resolvable:$true] %s151_s29 }
  0x10   : > { %s476_s4 = scalar_lea.hbm %s633_s27, 1024  ;;  %p478_p11 = pneg %p637_p9 }
  0x11   : > { %p477_p10 = scmp.ne.s32.totalorder %s633_s27, %s476_s4  ;;  %s481_s7 = scalar_lea.hbm %s777_s0, 2048 }
  0x12   : > { %p482_p0 = scmp.lt.u32.totalorder %s633_s27, %s777_s0  ;;  %p483_p1 = scmp.lt.u32.totalorder %s481_s7, %s476_s4 }
  0x13   : > { %p479_p12 = pnand %p478_p11, %p477_p10  ;;  %p485_p3 = scmp.lt.u32.totalorder %s476_s4, %s633_s27 }
  0x14   : > { %p484_p2 = por %p483_p1, %p482_p0 }
  0x15   : > { %p480_p13 = pneg %p479_p12 }
  0x16   : > { %p486_p4 = por %p485_p3, %p484_p2 }
  0x18   : > { %p487_p5 = pnand %p486_p4, %p480_p13 }
  0x1a   : > { %490 = shalt.err (!%p487_p5)
}
  0x1b   : > { %s491_s15 = scalar_lea.vmem %s641_s29, 1024  ;;  %s558_s17 = smov [#allocation2]  }
  0x1c   : > { %p492_p6 = scmp.ne.s32.totalorder %s641_s29, %s491_s15  ;;  %s496_s18 = sshll.u32 %s558_s17, 4  ;;  %s497_s18 = int_to_ptr.vmem [resolvable:$false] %s496_s18 }
  0x1d   : > { %s498_s19 = scalar_lea.vmem %s497_s18, 2048  ;;  %p499_p12 = scmp.lt.s32.totalorder %s641_s29, %s497_s18 }
  0x1e   : > { %p494_p8 = pnand %p492_p6, %p478_p11  ;;  %p500_p0 = scmp.lt.s32.totalorder %s498_s19, %s491_s15 }
  0x20   : > { %p495_p10 = pneg %p494_p8  ;;  %p501_p1 = por %p500_p0, %p499_p12 }
  0x22   : > { %p502_p2 = pnand %p501_p1, %p495_p10 }
  0x24   : > { %505 = shalt.err (!%p502_p2)
}
  0x25   : > { %s559_s22 = smov 256   ;;  %s560_s23 = smov 16  }
  0x26   : > { %423 = dma.hbm_to_vmem [thread:$0]  (!%p637_p9), %s633_s27, 1024, %s641_s29, %s643_s3, %s559_s22, %s559_s22, %s560_s23  }
  0x27   : > { %p407_p11 = scmp.ge.s32.totalorder %s556_s14, 1  ;;  %p159_p13 = scmp.lt.s32.totalorder %s556_s14, 3 }
  0x29   : > { %p160_p3 = pnand %p407_p11, %p159_p13 }
  0x2a   : > { %s165_s24 = sand.u32 (!%p160_p3), 1, %s540_s10  }
  0x2b   : > { %163 = sbr.rel (%p160_p3) target bundleno = 221 (0xdd), region = 24  ;;  %s408_s25 = sshll.u32 (!%p160_p3), %s165_s24, 6 }
  0x2c   : > { %s166_s26 = scalar_lea.sflag (!%p160_p3), [#allocation3], %s165_s24  ;;  %s169_s28 = scalar_lea.vmem (!%p160_p3), [#allocation2], %s408_s25 }
  0x32   : > { %531 = dma.done.wait (%p620_p7), %s166_s26, 1024  }
  0x33   : > { %533 = vsyncadd (%p620_p7), %s166_s26, 4294966272  ;;  %p209_p4 = scmp.eq.s32.totalorder %s548_s12, 0 }
  0x34   : > { %vm215_vm0 = vcmask (%p209_p4), 7168   ;;  %v561_v0 = vmov (%p209_p4), 0.0  }
  0x35   : > { %214 = sbr.rel (!%p209_p4) target bundleno = 60 (0x3c), region = 32  ;;  %216 = vst.msk [vmem:[%s778_s1] sm:$0xff] (%p209_p4), %vm215_vm0, %v561_v0  ;;  %217 = vst.msk [vmem:[%s778_s1 + $0x8] sm:$0xff] (%p209_p4), %vm215_vm0, %v561_v0 }
  0x36   : > { %218 = vst.msk [vmem:[%s778_s1 + $0x10] sm:$0xff] (%p209_p4), %vm215_vm0, %v561_v0  ;;  %219 = vst.msk [vmem:[%s778_s1 + $0x18] sm:$0xff] (%p209_p4), %vm215_vm0, %v561_v0 }
  0x37   : > { %220 = vst.msk [vmem:[%s779_s2] sm:$0xff] (%p209_p4), %vm215_vm0, %v561_v0  ;;  %221 = vst.msk [vmem:[%s779_s2 + $0x8] sm:$0xff] (%p209_p4), %vm215_vm0, %v561_v0 }
  0x38   : > { %222 = vst.msk [vmem:[%s779_s2 + $0x10] sm:$0xff] (%p209_p4), %vm215_vm0, %v561_v0  ;;  %223 = vst.msk [vmem:[%s779_s2 + $0x18] sm:$0xff] (%p209_p4), %vm215_vm0, %v561_v0 }
  0x3c PF: > { %v228_v1 = vld [vmem:[%s169_s28 + $0x20] sm:$0xff]  ;;  %v229_v2 = vld [vmem:[%s169_s28 + $0x28] sm:$0xff]  ;;  %v230_v6 = vld [vmem:[%s169_s28 + $0x30] sm:$0xff]  ;;  %vm252_vm1 = vcmask 7168  }
  0x3d   : > { %v224_v3 = vld [vmem:[%s169_s28] sm:$0xff]  ;;  %v242_v4 = vadd.f32 %v229_v2, %v228_v1  ;;  %v225_v5 = vld [vmem:[%s169_s28 + $0x8] sm:$0xff]  ;;  %v231_v7 = vld [vmem:[%s169_s28 + $0x38] sm:$0xff]  ;;  %v267_v18 = vmul.f32 %v230_v6, %v230_v6  ;;  %v265_v20 = vmul.f32 %v228_v1, %v228_v1  ;;  %v266_v21 = vmul.f32 %v229_v2, %v229_v2 }
  0x3e   : > { %v236_v8 = vadd.f32 %v225_v5, %v224_v3  ;;  %v226_v9 = vld [vmem:[%s169_s28 + $0x10] sm:$0xff]  ;;  %v227_v10 = vld [vmem:[%s169_s28 + $0x18] sm:$0xff]  ;;  %v245_v11 = vadd.f32 %v231_v7, %v230_v6  ;;  %v261_v14 = vmul.f32 %v224_v3, %v224_v3  ;;  %v262_v15 = vmul.f32 %v225_v5, %v225_v5  ;;  %v232_v26 = vld [vmem:[%s778_s1] sm:$0xff] }
  0x3f   : > { %243 = vadd.xlane.f32.xlu1 %v242_v4  ;;  %v263_v12 = vmul.f32 %v226_v9, %v226_v9  ;;  %v264_v13 = vmul.f32 %v227_v10, %v227_v10  ;;  %v239_v16 = vadd.f32 %v227_v10, %v226_v9  ;;  %v268_v19 = vmul.f32 %v231_v7, %v231_v7  ;;  %v234_v25 = vld [vmem:[%s778_s1 + $0x10] sm:$0xff]  ;;  %v235_v31 = vld [vmem:[%s778_s1 + $0x18] sm:$0xff]  ;;  %v233_v32 = vld [vmem:[%s778_s1 + $0x8] sm:$0xff] }
  0x40   : > { %237 = vadd.xlane.f32.xlu0 %v236_v8  ;;  %v269_v22 = vadd.f32 %v262_v15, %v261_v14  ;;  %v275_v24 = vadd.f32 %v266_v21, %v265_v20  ;;  %v258_v37 = vld [vmem:[%s779_s2 + $0x8] sm:$0xff]  ;;  %v257_v38 = vld [vmem:[%s779_s2] sm:$0xff]  ;;  %v260_v43 = vld [vmem:[%s779_s2 + $0x18] sm:$0xff] }
  0x41   : > { %v272_v17 = vadd.f32 %v264_v13, %v263_v12  ;;  %v278_v23 = vadd.f32 %v268_v19, %v267_v18  ;;  %v259_v44 = vld [vmem:[%s779_s2 + $0x10] sm:$0xff] }
  0x43   : > { %246 = vadd.xlane.f32.xlu1 %v245_v11 }
  0x44   : > { %240 = vadd.xlane.f32.xlu0 %v239_v16 }
  0x47   : > { %273 = vadd.xlane.f32.xlu1 %v272_v17 }
  0x48   : > { %270 = vadd.xlane.f32.xlu0 %v269_v22 }
  0x4b   : > { %279 = vadd.xlane.f32.xlu1 %v278_v23 }
  0x4c   : > { %276 = vadd.xlane.f32.xlu0 %v275_v24 }
  0xcc   : > { %v244_v27 = vpop.xlane.xlu1 %243 }
  0xcd   : > { %v250_v28 = vadd.f32 %v244_v27, %v234_v25  ;;  %v238_v29 = vpop.xlane.xlu0 %237 }
  0xce   : > { %v248_v30 = vadd.f32 %v238_v29, %v232_v26 }
  0xcf   : > { %255 = vst.msk [vmem:[%s778_s1 + $0x10] sm:$0xff] %vm252_vm1, %v250_v28 }
  0xd0   : > { %253 = vst.msk [vmem:[%s778_s1] sm:$0xff] %vm252_vm1, %v248_v30  ;;  %v247_v33 = vpop.xlane.xlu1 %246 }
  0xd1   : > { %v251_v34 = vadd.f32 %v247_v33, %v235_v31  ;;  %v241_v35 = vpop.xlane.xlu0 %240 }
  0xd2   : > { %v249_v36 = vadd.f32 %v241_v35, %v233_v32 }
  0xd3   : > { %256 = vst.msk [vmem:[%s778_s1 + $0x18] sm:$0xff] %vm252_vm1, %v251_v34 }
  0xd4   : > { %254 = vst.msk [vmem:[%s778_s1 + $0x8] sm:$0xff] %vm252_vm1, %v249_v36  ;;  %v274_v39 = vpop.xlane.xlu1 %273 }
  0xd5   : > { %v282_v40 = vadd.f32 %v274_v39, %v258_v37  ;;  %v271_v41 = vpop.xlane.xlu0 %270 }
  0xd6   : > { %v281_v42 = vadd.f32 %v271_v41, %v257_v38 }
  0xd7   : > { %286 = vst.msk [vmem:[%s779_s2 + $0x8] sm:$0xff] %vm252_vm1, %v282_v40 }
  0xd8   : > { %285 = vst.msk [vmem:[%s779_s2] sm:$0xff] %vm252_vm1, %v281_v42  ;;  %v280_v45 = vpop.xlane.xlu1 %279 }
  0xd9   : > { %v284_v46 = vadd.f32 %v280_v45, %v260_v43  ;;  %v277_v47 = vpop.xlane.xlu0 %276 }
  0xda   : > { %v283_v48 = vadd.f32 %v277_v47, %v259_v44 }
  0xdb   : > { %288 = vst.msk [vmem:[%s779_s2 + $0x18] sm:$0xff] %vm252_vm1, %v284_v46 }
  0xdc   : > { %287 = vst.msk [vmem:[%s779_s2 + $0x10] sm:$0xff] %vm252_vm1, %v283_v48 }
  0xdd PF: > { %s16_s14 = sadd.s32 1, %s556_s14   ;;  %s783_s9 = smov %s540_s10 }
  0xde   : > { %p13_p7 = scmp.ge.s32.totalorder %s16_s14, 4   ;;  %s784_s10 = smov %s544_s11 }
  0xdf   : > { %s785_s11 = smov %s626_s21  ;;  %s786_s12 = smov %s552_s13 }
  0xe0   : > { %s787_s13 = smov %s789_s16  ;;  %15 = sbr.rel (!%p13_p7) target bundleno = 4 (0x4), region = 80 }
  0xe7   :  { %328 = vsyncpa [#allocation3], 1 }
  0xe8   :  { %330 = vsyncpa [#allocation3 + $0x1], 1 }

</bundles_post_ra>
